<compile_context>
chip_gen: v5e
topology: v5e:2x2
jax: 0.10.0
libtpu: 0.0.40
codegen_flags: <defaults>
</compile_context>

<pallas_src>
import functools

import jax
import jax.numpy as jnp
from jax.experimental import pallas as pl
from jax.experimental.pallas import tpu as pltpu


def _round_up(x, m):
    return (x + m - 1) // m * m


def _attention_kernel(inp2d_ref, src_ref, w_in_ref, w_mix_ref, w_inp_ref,
                      out_ref, attn_ref, mix_ref, *, bb, tt, s_valid):
    # Per-grid-step refs:
    #   inp2d_ref: (Bb*Tt, Din_p)       flattened (batch, time) rows
    #   src_ref  : (Bb, S_p, Dsrc_p)    source hiddens for the Bb batches
    #   w_in_ref : (Din_p, Dsrc_p)      input_proj.weight.T           (padded)
    #   w_mix_ref: (Dsrc_p, Dout_p)     output_proj.weight[:, :Dsrc].T (padded)
    #   w_inp_ref: (Din_p, Dout_p)      output_proj.weight[:, Dsrc:].T (padded)
    #   out_ref  : (Bb*Tt, Dout_p)      lane-dense output slab
    #   attn_ref : (Bb*Tt, S_p)         lane-dense attention slab
    #   mix_ref  : VMEM scratch (Bb*Tt, Dsrc_p)
    inp2d = inp2d_ref[...]
    s_pad = attn_ref.shape[1]

    # input_proj over all Bb*Tt rows at once -> one large-row MXU matmul.
    x2d = jnp.dot(inp2d, w_in_ref[...], preferred_element_type=jnp.float32)

    # Per-batch attention (logits / softmax / mix); statically unrolled, bb is
    # small by construction.
    for b in range(bb):
        lo = b * tt
        xb = x2d[lo:lo + tt, :]                     # (Tt, Dsrc_p), sublane-aligned
        srcb = src_ref[b]                           # (S_p, Dsrc_p)

        # logits = xb @ srcb^T, contracting the last dims directly (no
        # in-kernel transpose of source_hids).
        logits = jax.lax.dot_general(
            xb, srcb, (((1,), (1,)), ((), ())),
            preferred_element_type=jnp.float32)     # (Tt, S_p)

        # TODO(synk): optional attention mask (self.mask) not implemented;
        # the module default is mask=None.
        if s_valid < s_pad:
            # Mask padded source positions so they get zero softmax weight.
            col = jax.lax.broadcasted_iota(jnp.int32, logits.shape, 1)
            logits = jnp.where(col < s_valid, logits, -1e30)

        # Numerically-stable softmax over the source length.
        m = jnp.max(logits, axis=-1, keepdims=True)
        e = jnp.exp(logits - m)
        denom = jnp.sum(e, axis=-1, keepdims=True)
        r = pl.reciprocal(denom, approx=True)       # EUP vrcp (free slot)
        r = r * (2.0 - denom * r)                   # one Newton step -> ~exact
        attn_b = e * r                              # (Tt, S_p)

        attn_ref[lo:lo + tt, :] = attn_b.astype(attn_ref.dtype)
        mix_ref[lo:lo + tt, :] = jnp.dot(attn_b, srcb,
                                         preferred_element_type=jnp.float32)

    # output_proj over all rows at once (flattened), split-concat identity.
    out2d = jnp.tanh(
        jnp.dot(mix_ref[...], w_mix_ref[...], preferred_element_type=jnp.float32)
        + jnp.dot(inp2d, w_inp_ref[...], preferred_element_type=jnp.float32)
    )
    out_ref[...] = out2d.astype(out_ref.dtype)


def attention_forward(inp, source_hids, w_input_proj, w_output_proj,
                      *, rows_target=256):
    """
    inp:           (B, T, input_dim)                float32
    source_hids:   (B, S, source_dim)               float32
    w_input_proj:  (source_dim, input_dim)          (PyTorch nn.Linear layout)
    w_output_proj: (output_dim, input_dim + source_dim)
    returns (output (B, T, output_dim), attn (B, T, S))

    rows_target: row-slab size fed to the MXU per grid step (256 suits
    v6e/v7x's 256x256 MXU; 128 is enough to saturate v5e).
    """
    f32 = jnp.float32
    B, T, Din = inp.shape
    _, S, Dsrc = source_hids.shape
    Dout, Dcat = w_output_proj.shape
    assert Dcat == Din + Dsrc

    # Lane-dense padding (last dims -> multiples of 128, time -> multiple of 8).
    Din_p = _round_up(Din, 128)
    Dsrc_p = _round_up(Dsrc, 128)
    Dout_p = _round_up(Dout, 128)
    S_p = _round_up(S, 128)
    T_p = _round_up(T, 8)

    # Tiling: flatten (batch, time) rows and aim for ~rows_target rows/step.
    if T_p >= rows_target:
        # Tile the time axis (batch block = 1).
        Tt = rows_target if T_p % rows_target == 0 else T_p
        Bb = 1
    else:
        # Small T: block several batch elements per step.
        Tt = T_p
        Bb = max(1, rows_target // T_p)
        # Keep the (Bb, S_p, Dsrc_p) source block modest in VMEM (~<= 8 MiB).
        src_cap = max(1, (8 * 1024 * 1024) // (S_p * Dsrc_p * 4))
        Bb = min(Bb, src_cap, B)
        while B % Bb:
            Bb -= 1
    nb, nt = B // Bb, T_p // Tt
    Rb = Bb * Tt  # rows per grid step

    # TODO(synk): for very large S (e.g. >> 4K) a flash-style running-softmax
    # loop over S tiles would be needed to keep the per-step blocks in VMEM
    # (especially on v7x's 64 MiB); not needed at decoder-scale shapes.

    # Pad + flatten inputs, pre-transpose / split weights (plain JAX glue).
    inp_p = jnp.zeros((B, T_p, Din_p), f32).at[:, :T, :Din].set(inp.astype(f32))
    src_p = jnp.zeros((B, S_p, Dsrc_p), f32).at[:, :S, :Dsrc].set(
        source_hids.astype(f32))
    inp2d = inp_p.reshape(B * T_p, Din_p)

    w_op = jnp.asarray(w_output_proj, f32)
    w_in = jnp.zeros((Din_p, Dsrc_p), f32).at[:Din, :Dsrc].set(
        jnp.asarray(w_input_proj, f32).T)
    w_mix = jnp.zeros((Dsrc_p, Dout_p), f32).at[:Dsrc, :Dout].set(
        w_op[:, :Dsrc].T)
    w_inp = jnp.zeros((Din_p, Dout_p), f32).at[:Din, :Dout].set(
        w_op[:, Dsrc:].T)

    kernel = functools.partial(_attention_kernel, bb=Bb, tt=Tt, s_valid=S)

    out2d, attn2d = pl.pallas_call(
        kernel,
        out_shape=(
            jax.ShapeDtypeStruct((B * T_p, Dout_p), f32),
            jax.ShapeDtypeStruct((B * T_p, S_p), f32),
        ),
        grid_spec=pltpu.PrefetchScalarGridSpec(
            num_scalar_prefetch=0,
            grid=(nb, nt),
            in_specs=[
                # Flattened (batch, time) rows.
                pl.BlockSpec((Rb, Din_p), lambda bi, ti: (bi * nt + ti, 0)),
                # Per-batch-block source hiddens (constant across the ti axis,
                # so not re-fetched while tiling time).
                pl.BlockSpec((Bb, S_p, Dsrc_p), lambda bi, ti: (bi, 0, 0)),
                # Weights: constant index maps -> DMA'd once, stay resident.
                pl.BlockSpec((Din_p, Dsrc_p), lambda bi, ti: (0, 0)),
                pl.BlockSpec((Dsrc_p, Dout_p), lambda bi, ti: (0, 0)),
                pl.BlockSpec((Din_p, Dout_p), lambda bi, ti: (0, 0)),
            ],
            out_specs=[
                pl.BlockSpec((Rb, Dout_p), lambda bi, ti: (bi * nt + ti, 0)),
                pl.BlockSpec((Rb, S_p), lambda bi, ti: (bi * nt + ti, 0)),
            ],
            scratch_shapes=[pltpu.VMEM((Rb, Dsrc_p), f32)],
        ),
        compiler_params=pltpu.CompilerParams(
            dimension_semantics=("parallel", "parallel"),
            vmem_limit_bytes=32 * 1024 * 1024,
        ),
    )(inp2d, src_p, w_in, w_mix, w_inp)

    # Un-flatten and strip padding (wrapper-side XLA glue).
    out = out2d.reshape(B, T_p, Dout_p)[:, :T, :Dout]
    attn = attn2d.reshape(B, T_p, S_p)[:, :T, :S]
    return out, attn


def _reference_forward(inp, source_hids, w_input_proj, w_output_proj):
    # Pure-JAX reference mirroring the PyTorch module exactly.
    x = jnp.einsum("btd,sd->bts", inp, w_input_proj)          # input_proj
    logits = jnp.einsum("bts,bks->btk", x, source_hids)       # bmm(x, src^T)
    attn = jax.nn.softmax(logits, axis=-1)
    mix = jnp.einsum("btk,bkd->btd", attn, source_hids)       # bmm(attn, src)
    combined = jnp.concatenate([mix, inp], axis=2)
    output = jnp.tanh(jnp.einsum("btc,oc->bto", combined, w_output_proj))
    return output, attn


if __name__ == "__main__":
    B, T, S = 2, 8, 8
    input_dim = 32
    source_dim = 32
    output_dim = 32

    key = jax.random.PRNGKey(0)
    k1, k2, k3, k4 = jax.random.split(key, 4)

    inp = jax.random.normal(k1, (B, T, input_dim), dtype=jnp.float32)
    source_hids = jax.random.normal(k2, (B, S, source_dim), dtype=jnp.float32)

    # Deterministic parameter init (uniform, PyTorch Linear-style bound), bias=False.
    bound_in = 1.0 / (input_dim ** 0.5)
    bound_out = 1.0 / ((input_dim + source_dim) ** 0.5)
    w_input_proj = jax.random.uniform(
        k3, (source_dim, input_dim), minval=-bound_in, maxval=bound_in,
        dtype=jnp.float32)
    w_output_proj = jax.random.uniform(
        k4, (output_dim, input_dim + source_dim), minval=-bound_out,
        maxval=bound_out, dtype=jnp.float32)

    out, attn = attention_forward(inp, source_hids, w_input_proj, w_output_proj)
    out = jax.block_until_ready(out)
    attn = jax.block_until_ready(attn)

    ref_out, ref_attn = _reference_forward(inp, source_hids, w_input_proj,
                                           w_output_proj)
    assert out.shape == (B, T, output_dim)
    assert attn.shape == (B, T, S)
    # Tolerance slightly relaxed vs 1e-5 for the EUP approx-reciprocal
    # (+ Newton refinement) softmax normalization.
    assert jnp.allclose(out, ref_out, atol=2e-5, rtol=2e-5), \
        float(jnp.max(jnp.abs(out - ref_out)))
    assert jnp.allclose(attn, ref_attn, atol=2e-5, rtol=2e-5), \
        float(jnp.max(jnp.abs(attn - ref_attn)))

    print("KERNEL_OK")
</pallas_src>

<mosaic_0001>
module attributes {stable_mosaic.version = 11 : i64} {
  func.func @_attention_kernel(%arg0: i32, %arg1: i32, %arg2: memref<16x128xf32, #tpu.memory_space<vmem>>, %arg3: memref<2x128x128xf32, #tpu.memory_space<vmem>>, %arg4: memref<128x128xf32, #tpu.memory_space<vmem>>, %arg5: memref<128x128xf32, #tpu.memory_space<vmem>>, %arg6: memref<128x128xf32, #tpu.memory_space<vmem>>, %arg7: memref<16x128xf32, #tpu.memory_space<vmem>>, %arg8: memref<16x128xf32, #tpu.memory_space<vmem>>, %arg9: memref<16x128xf32, #tpu.memory_space<vmem>>) attributes {dimension_semantics = [#tpu.dimension_semantics<parallel>, #tpu.dimension_semantics<parallel>], iteration_bounds = array<i64: 1, 1>, scalar_prefetch = 0 : i64, scratch_operands = 1 : i64, tpu.core_type = #tpu.core_type<tc>, window_params = [{transform_indices = @transform_0, window_bounds = array<i64: 16, 128>}, {transform_indices = @transform_1, window_bounds = array<i64: 2, 128, 128>}, {pipeline_mode = #tpu.pipeline_mode<synchronous>, transform_indices = @transform_2, window_bounds = array<i64: 128, 128>}, {pipeline_mode = #tpu.pipeline_mode<synchronous>, transform_indices = @transform_3, window_bounds = array<i64: 128, 128>}, {pipeline_mode = #tpu.pipeline_mode<synchronous>, transform_indices = @transform_4, window_bounds = array<i64: 128, 128>}, {transform_indices = @transform_5, window_bounds = array<i64: 16, 128>}, {transform_indices = @transform_6, window_bounds = array<i64: 16, 128>}]} {
    %c0 = arith.constant 0 : index
    %c0_0 = arith.constant 0 : index
    %0 = vector.load %arg2[%c0, %c0_0] : memref<16x128xf32, #tpu.memory_space<vmem>>, vector<16x128xf32>
    %c0_1 = arith.constant 0 : index
    %c0_2 = arith.constant 0 : index
    %1 = vector.load %arg4[%c0_1, %c0_2] : memref<128x128xf32, #tpu.memory_space<vmem>>, vector<128x128xf32>
    %cst = arith.constant dense<0.000000e+00> : vector<16x128xf32>
    %2 = tpu.matmul %0, %1, %cst {dimension_numbers = #tpu.dot_dimension_numbers<[1], [0], [0], [1], [0, 0, 1, 1], [], []>} : vector<16x128xf32>, vector<128x128xf32>, vector<16x128xf32> -> vector<16x128xf32>
    %3 = vector.extract_strided_slice %2 {offsets = [0, 0], sizes = [8, 128], strides = [1, 1]} : vector<16x128xf32> to vector<8x128xf32>
    %c0_3 = arith.constant 0 : index
    %c0_4 = arith.constant 0 : index
    %c0_5 = arith.constant 0 : index
    %4 = vector.load %arg3[%c0_3, %c0_4, %c0_5] : memref<2x128x128xf32, #tpu.memory_space<vmem>>, vector<1x128x128xf32>
    %5 = vector.shape_cast %4 : vector<1x128x128xf32> to vector<128x128xf32>
    %cst_6 = arith.constant dense<0.000000e+00> : vector<8x128xf32>
    %6 = tpu.matmul %3, %5, %cst_6 {dimension_numbers = #tpu.dot_dimension_numbers<[1], [1], [0], [0], [0, 0, 1, 0], [], []>} : vector<8x128xf32>, vector<128x128xf32>, vector<8x128xf32> -> vector<8x128xf32>
    %7 = tpu.iota {dimensions = array<i32: 1>} : vector<8x128xi32>
    %c8_i32 = arith.constant 8 : i32
    %8 = vector.broadcast %c8_i32 : i32 to vector<8x128xi32>
    %9 = arith.cmpi slt, %7, %8 : vector<8x128xi32>
    %cst_7 = arith.constant -1.000000e+30 : f32
    %10 = vector.broadcast %cst_7 : f32 to vector<8x128xf32>
    %11 = arith.select %9, %6, %10 : vector<8x128xi1>, vector<8x128xf32>
    %cst_8 = arith.constant dense<0xFF800000> : vector<8xf32>
    %12 = vector.multi_reduction <maximumf>, %11, %cst_8 [1] : vector<8x128xf32> to vector<8xf32>
    %13 = vector.shape_cast %12 : vector<8xf32> to vector<8x1xf32>
    %14 = vector.broadcast %13 : vector<8x1xf32> to vector<8x128xf32>
    %15 = arith.subf %11, %14 : vector<8x128xf32>
    %16 = math.exp %15 : vector<8x128xf32>
    %cst_9 = arith.constant dense<0.000000e+00> : vector<8xf32>
    %17 = vector.multi_reduction <add>, %16, %cst_9 [1] : vector<8x128xf32> to vector<8xf32>
    %18 = vector.shape_cast %17 : vector<8xf32> to vector<8x1xf32>
    %19 = tpu.reciprocal %18 {approx = true} : vector<8x1xf32> -> vector<8x1xf32>
    %20 = arith.mulf %18, %19 : vector<8x1xf32>
    %cst_10 = arith.constant 2.000000e+00 : f32
    %21 = vector.broadcast %cst_10 : f32 to vector<8x1xf32>
    %22 = arith.subf %21, %20 : vector<8x1xf32>
    %23 = arith.mulf %19, %22 : vector<8x1xf32>
    %24 = vector.broadcast %23 : vector<8x1xf32> to vector<8x128xf32>
    %25 = arith.mulf %16, %24 : vector<8x128xf32>
    %c0_11 = arith.constant 0 : index
    %c0_12 = arith.constant 0 : index
    %26 = vector.load %arg8[%c0_11, %c0_12] : memref<16x128xf32, #tpu.memory_space<vmem>>, vector<8x128xf32>
    tpu.vector_store %arg8[%c0_11, %c0_12], %25 {strides = array<i32>} : memref<16x128xf32, #tpu.memory_space<vmem>>, vector<8x128xf32>,
    %cst_13 = arith.constant dense<0.000000e+00> : vector<8x128xf32>
    %27 = tpu.matmul %25, %5, %cst_13 {dimension_numbers = #tpu.dot_dimension_numbers<[1], [0], [0], [1], [0, 0, 1, 1], [], []>} : vector<8x128xf32>, vector<128x128xf32>, vector<8x128xf32> -> vector<8x128xf32>
    %c0_14 = arith.constant 0 : index
    %c0_15 = arith.constant 0 : index
    %28 = vector.load %arg9[%c0_14, %c0_15] : memref<16x128xf32, #tpu.memory_space<vmem>>, vector<8x128xf32>
    tpu.vector_store %arg9[%c0_14, %c0_15], %27 {strides = array<i32>} : memref<16x128xf32, #tpu.memory_space<vmem>>, vector<8x128xf32>,
    %29 = vector.extract_strided_slice %2 {offsets = [8, 0], sizes = [8, 128], strides = [1, 1]} : vector<16x128xf32> to vector<8x128xf32>
    %c1 = arith.constant 1 : index
    %c0_16 = arith.constant 0 : index
    %c0_17 = arith.constant 0 : index
    %30 = vector.load %arg3[%c1, %c0_16, %c0_17] : memref<2x128x128xf32, #tpu.memory_space<vmem>>, vector<1x128x128xf32>
    %31 = vector.shape_cast %30 : vector<1x128x128xf32> to vector<128x128xf32>
    %cst_18 = arith.constant dense<0.000000e+00> : vector<8x128xf32>
    %32 = tpu.matmul %29, %31, %cst_18 {dimension_numbers = #tpu.dot_dimension_numbers<[1], [1], [0], [0], [0, 0, 1, 0], [], []>} : vector<8x128xf32>, vector<128x128xf32>, vector<8x128xf32> -> vector<8x128xf32>
    %33 = tpu.iota {dimensions = array<i32: 1>} : vector<8x128xi32>
    %c8_i32_19 = arith.constant 8 : i32
    %34 = vector.broadcast %c8_i32_19 : i32 to vector<8x128xi32>
    %35 = arith.cmpi slt, %33, %34 : vector<8x128xi32>
    %cst_20 = arith.constant -1.000000e+30 : f32
    %36 = vector.broadcast %cst_20 : f32 to vector<8x128xf32>
    %37 = arith.select %35, %32, %36 : vector<8x128xi1>, vector<8x128xf32>
    %cst_21 = arith.constant dense<0xFF800000> : vector<8xf32>
    %38 = vector.multi_reduction <maximumf>, %37, %cst_21 [1] : vector<8x128xf32> to vector<8xf32>
    %39 = vector.shape_cast %38 : vector<8xf32> to vector<8x1xf32>
    %40 = vector.broadcast %39 : vector<8x1xf32> to vector<8x128xf32>
    %41 = arith.subf %37, %40 : vector<8x128xf32>
    %42 = math.exp %41 : vector<8x128xf32>
    %cst_22 = arith.constant dense<0.000000e+00> : vector<8xf32>
    %43 = vector.multi_reduction <add>, %42, %cst_22 [1] : vector<8x128xf32> to vector<8xf32>
    %44 = vector.shape_cast %43 : vector<8xf32> to vector<8x1xf32>
    %45 = tpu.reciprocal %44 {approx = true} : vector<8x1xf32> -> vector<8x1xf32>
    %46 = arith.mulf %44, %45 : vector<8x1xf32>
    %cst_23 = arith.constant 2.000000e+00 : f32
    %47 = vector.broadcast %cst_23 : f32 to vector<8x1xf32>
    %48 = arith.subf %47, %46 : vector<8x1xf32>
    %49 = arith.mulf %45, %48 : vector<8x1xf32>
    %50 = vector.broadcast %49 : vector<8x1xf32> to vector<8x128xf32>
    %51 = arith.mulf %42, %50 : vector<8x128xf32>
    %c8 = arith.constant 8 : index
    %c0_24 = arith.constant 0 : index
    %52 = vector.load %arg8[%c8, %c0_24] : memref<16x128xf32, #tpu.memory_space<vmem>>, vector<8x128xf32>
    tpu.vector_store %arg8[%c8, %c0_24], %51 {strides = array<i32>} : memref<16x128xf32, #tpu.memory_space<vmem>>, vector<8x128xf32>,
    %cst_25 = arith.constant dense<0.000000e+00> : vector<8x128xf32>
    %53 = tpu.matmul %51, %31, %cst_25 {dimension_numbers = #tpu.dot_dimension_numbers<[1], [0], [0], [1], [0, 0, 1, 1], [], []>} : vector<8x128xf32>, vector<128x128xf32>, vector<8x128xf32> -> vector<8x128xf32>
    %c8_26 = arith.constant 8 : index
    %c0_27 = arith.constant 0 : index
    %54 = vector.load %arg9[%c8_26, %c0_27] : memref<16x128xf32, #tpu.memory_space<vmem>>, vector<8x128xf32>
    tpu.vector_store %arg9[%c8_26, %c0_27], %53 {strides = array<i32>} : memref<16x128xf32, #tpu.memory_space<vmem>>, vector<8x128xf32>,
    %c0_28 = arith.constant 0 : index
    %c0_29 = arith.constant 0 : index
    %55 = vector.load %arg9[%c0_28, %c0_29] : memref<16x128xf32, #tpu.memory_space<vmem>>, vector<16x128xf32>
    %c0_30 = arith.constant 0 : index
    %c0_31 = arith.constant 0 : index
    %56 = vector.load %arg5[%c0_30, %c0_31] : memref<128x128xf32, #tpu.memory_space<vmem>>, vector<128x128xf32>
    %cst_32 = arith.constant dense<0.000000e+00> : vector<16x128xf32>
    %57 = tpu.matmul %55, %56, %cst_32 {dimension_numbers = #tpu.dot_dimension_numbers<[1], [0], [0], [1], [0, 0, 1, 1], [], []>} : vector<16x128xf32>, vector<128x128xf32>, vector<16x128xf32> -> vector<16x128xf32>
    %c0_33 = arith.constant 0 : index
    %c0_34 = arith.constant 0 : index
    %58 = vector.load %arg6[%c0_33, %c0_34] : memref<128x128xf32, #tpu.memory_space<vmem>>, vector<128x128xf32>
    %cst_35 = arith.constant dense<0.000000e+00> : vector<16x128xf32>
    %59 = tpu.matmul %0, %58, %cst_35 {dimension_numbers = #tpu.dot_dimension_numbers<[1], [0], [0], [1], [0, 0, 1, 1], [], []>} : vector<16x128xf32>, vector<128x128xf32>, vector<16x128xf32> -> vector<16x128xf32>
    %60 = arith.addf %57, %59 : vector<16x128xf32>
    %61 = math.tanh %60 : vector<16x128xf32>
    %c0_36 = arith.constant 0 : index
    %c0_37 = arith.constant 0 : index
    %62 = vector.load %arg7[%c0_36, %c0_37] : memref<16x128xf32, #tpu.memory_space<vmem>>, vector<16x128xf32>
    tpu.vector_store %arg7[%c0_36, %c0_37], %61 {strides = array<i32>} : memref<16x128xf32, #tpu.memory_space<vmem>>, vector<16x128xf32>,
    return
  }
  func.func @transform_0(%arg0: i32, %arg1: i32) -> (i32, i32) {
    %c1_i32 = arith.constant 1 : i32
    %0 = arith.muli %arg0, %c1_i32 : i32
    %1 = arith.addi %0, %arg1 : i32
    %c0_i32 = arith.constant 0 : i32
    %c0_i32_0 = arith.constant 0 : i32
    return %1, %c0_i32 : i32, i32
  }
  func.func @transform_1(%arg0: i32, %arg1: i32) -> (i32, i32, i32) {
    %c0_i32 = arith.constant 0 : i32
    %c0_i32_0 = arith.constant 0 : i32
    %c0_i32_1 = arith.constant 0 : i32
    return %arg0, %c0_i32, %c0_i32_0 : i32, i32, i32
  }
  func.func @transform_2(%arg0: i32, %arg1: i32) -> (i32, i32) {
    %c0_i32 = arith.constant 0 : i32
    %c0_i32_0 = arith.constant 0 : i32
    %c0_i32_1 = arith.constant 0 : i32
    return %c0_i32, %c0_i32_0 : i32, i32
  }
  func.func @transform_3(%arg0: i32, %arg1: i32) -> (i32, i32) {
    %c0_i32 = arith.constant 0 : i32
    %c0_i32_0 = arith.constant 0 : i32
    %c0_i32_1 = arith.constant 0 : i32
    return %c0_i32, %c0_i32_0 : i32, i32
  }
  func.func @transform_4(%arg0: i32, %arg1: i32) -> (i32, i32) {
    %c0_i32 = arith.constant 0 : i32
    %c0_i32_0 = arith.constant 0 : i32
    %c0_i32_1 = arith.constant 0 : i32
    return %c0_i32, %c0_i32_0 : i32, i32
  }
  func.func @transform_5(%arg0: i32, %arg1: i32) -> (i32, i32) {
    %c1_i32 = arith.constant 1 : i32
    %0 = arith.muli %arg0, %c1_i32 : i32
    %1 = arith.addi %0, %arg1 : i32
    %c0_i32 = arith.constant 0 : i32
    %c0_i32_0 = arith.constant 0 : i32
    return %1, %c0_i32 : i32, i32
  }
  func.func @transform_6(%arg0: i32, %arg1: i32) -> (i32, i32) {
    %c1_i32 = arith.constant 1 : i32
    %0 = arith.muli %arg0, %c1_i32 : i32
    %1 = arith.addi %0, %arg1 : i32
    %c0_i32 = arith.constant 0 : i32
    %c0_i32_0 = arith.constant 0 : i32
    return %1, %c0_i32 : i32, i32
  }
}

</mosaic_0001>

<bundles_post_ra>
// kernel: tpu_custom_call.1
= control target key start
LH: loop header
LB: loop body
LE: loop exit
PB: predicated region body
PF: predicated region fallthrough
CT: control target
= control target key end

     0   :  { %12 = vsyncpa [#allocation4], 0  ;;  %s739_s0 = inlined_call_operand.hbm [shape: f32[16,128], index: 0, kind: input, shape index: {}]   ;;  %s740_s1 = inlined_call_operand.hbm [shape: f32[2,128,128], index: 1, kind: input, shape index: {}]   ;;  %s741_s2 = inlined_call_operand.hbm [shape: f32[128,128], index: 2, kind: input, shape index: {}]   ;;  %s742_s3 = inlined_call_operand.hbm [shape: f32[128,128], index: 3, kind: input, shape index: {}]   ;;  %s743_s4 = inlined_call_operand.hbm [shape: f32[128,128], index: 4, kind: input, shape index: {}]   ;;  %s744_s5 = inlined_call_operand.hbm [shape: f32[16,128], index: 5, kind: output, shape index: {0}]   ;;  %s745_s6 = inlined_call_operand.hbm [shape: f32[16,128], index: 6, kind: output, shape index: {1}]  }
   0x1   :  { %13 = vsyncpa [#allocation7], 0 }
   0x2   :  { %14 = vsyncpa [#allocation10], 0 }
   0x3   :  { %15 = vsyncpa [#allocation5], 0 }
   0x4   :  { %16 = vsyncpa [#allocation14], 0  ;;  %s38_s23 = sshll.u32 %s740_s1, 4  ;;  %s629_s24 = smov [#allocation6]   ;;  %s39_s23 = int_to_ptr.hbm [resolvable:$true] %s38_s23 }
   0x5   :  { %s40_s25 = sshll.u32 %s629_s24, 4  ;;  %s64_s28 = sshll.u32 %s742_s3, 4  ;;  %s41_s25 = int_to_ptr.vmem [resolvable:$true] %s40_s25  ;;  %s65_s28 = int_to_ptr.hbm [resolvable:$true] %s64_s28 }
   0x6   :  { %s630_s29 = smov 128   ;;  %s631_s30 = smov 8  }
   0x7   :  { %46 = dma.hbm_to_vmem [thread:$0]  %s39_s23, 4096, %s41_s25, [#allocation7], %s630_s29, %s630_s29, %s631_s30  }
   0x8   :  { %s632_s7 = smov [#allocation9]   ;;  %s25_s1 = sshll.u32 %s739_s0, 4  ;;  %s26_s1 = int_to_ptr.hbm [resolvable:$true] %s25_s1 }
   0x9   :  { %s66_s8 = sshll.u32 %s632_s7, 4  ;;  %s51_s12 = sshll.u32 %s741_s2, 4  ;;  %s67_s8 = int_to_ptr.vmem [resolvable:$true] %s66_s8  ;;  %s52_s12 = int_to_ptr.hbm [resolvable:$true] %s51_s12 }
   0xa   :  { %72 = dma.hbm_to_vmem [thread:$0]  %s65_s28, 2048, %s67_s8, [#allocation10], %s630_s29, %s630_s29, %s631_s30  }
   0xb   :  { %s633_s13 = smov [#allocation3]   ;;  %s634_s15 = smov [#allocation8]  }
   0xc   :  { %s27_s14 = sshll.u32 %s633_s13, 4  ;;  %s53_s0 = sshll.u32 %s634_s15, 4  ;;  %s28_s14 = int_to_ptr.vmem [resolvable:$true] %s27_s14  ;;  %s54_s0 = int_to_ptr.vmem [resolvable:$true] %s53_s0 }
   0xd   :  { %33 = dma.hbm_to_vmem [thread:$0]  %s26_s1, 256, %s28_s14, [#allocation4], %s630_s29, %s630_s29, %s631_s30  }
   0xe   :  { %s77_s18 = sshll.u32 %s743_s4, 4  ;;  %s635_s2 = smov [#allocation11]   ;;  %s78_s18 = int_to_ptr.hbm [resolvable:$true] %s77_s18 }
   0xf   :  { %59 = dma.hbm_to_vmem [thread:$0]  %s52_s12, 2048, %s54_s0, [#allocation7], %s630_s29, %s630_s29, %s631_s30  }
  0x10   :  { %s79_s19 = sshll.u32 %s635_s2, 4  ;;  %s80_s19 = int_to_ptr.vmem [resolvable:$true] %s79_s19 }
  0x11   :  { %85 = dma.hbm_to_vmem [thread:$0]  %s78_s18, 2048, %s80_s19, [#allocation10], %s630_s29, %s630_s29, %s631_s30  }
  0x12   :  { %619 = dma.done.wait [#allocation4], 256  }
  0x13   :  { %620 = vsyncadd [#allocation4], 4294967040 }
  0x14   :  { %621 = dma.done.wait [#allocation7], 6144  }
  0x15   :  { %622 = vsyncadd [#allocation7], 4294961152 }
  0x16   :  { %623 = dma.done.wait [#allocation10], 4096  }
  0x17   :  { %624 = vsyncadd [#allocation10], 4294963200  ;;  %v129_v0 = vld [vmem:[#allocation8 + $0x78] sm:$0xff]  ;;  %v128_v1 = vld [vmem:[#allocation8 + $0x70] sm:$0xff]  ;;  %v189_v52 = vlaneseq  ;;  %s636_s4 = smov [#allocation13]   ;;  %s410_s23 = sshll.u32 %s745_s6, 4  ;;  %s411_s23 = int_to_ptr.hbm [resolvable:$true] %s410_s23 }
  0x18   :  { %130 = vmatpush.msra.mxu1 %v129_v0  ;;  %v127_v2 = vld [vmem:[#allocation8 + $0x68] sm:$0xff]  ;;  %v126_v3 = vld [vmem:[#allocation8 + $0x60] sm:$0xff]  ;;  %v125_v4 = vld [vmem:[#allocation8 + $0x58] sm:$0xff]  ;;  %s408_s20 = sshll.u32 %s636_s4, 4  ;;  %s637_s24 = smov [#allocation12]   ;;  %s409_s20 = int_to_ptr.vmem [resolvable:$true] %s408_s20 }
  0x19   :  { %v124_v5 = vld [vmem:[#allocation8 + $0x50] sm:$0xff]  ;;  %v168_v6 = vld [vmem:[#allocation6 + $0x78] sm:$0xff]  ;;  %v123_v8 = vld [vmem:[#allocation8 + $0x48] sm:$0xff]  ;;  %v190_v53 = vand.u32 127, %v189_v52  ;;  %s391_s25 = sshll.u32 %s637_s24, 4  ;;  %s393_s27 = sshll.u32 %s744_s5, 4  ;;  %s392_s25 = int_to_ptr.vmem [resolvable:$true] %s391_s25  ;;  %s394_s27 = int_to_ptr.hbm [resolvable:$true] %s393_s27 }
  0x1a   :  { %131 = vmatpush.msra.mxu1 %v128_v1  ;;  %v243_v7 = vld [vmem:[#allocation6 + $0xf8] sm:$0xff]  ;;  %206 = vmatpush.msra.mxu2 %v168_v6  ;;  %v167_v9 = vld [vmem:[#allocation6 + $0x70] sm:$0xff]  ;;  %v122_v10 = vld [vmem:[#allocation8 + $0x40] sm:$0xff] }
  0x1b   :  { %244 = vmatpush.xpose.msra.mxu3 %v243_v7  ;;  %278 = vmatpush.msra.mxu0 %v243_v7  ;;  %v166_v11 = vld [vmem:[#allocation6 + $0x68] sm:$0xff]  ;;  %v242_v12 = vld [vmem:[#allocation6 + $0xf0] sm:$0xff]  ;;  %v121_v13 = vld [vmem:[#allocation8 + $0x38] sm:$0xff]  ;;  %vm191_vm0 = vcmp.lt.s32.totalorder %v190_v53, 8 }
  0x1c   :  { %132 = vmatpush.msra.mxu1 %v127_v2  ;;  %207 = vmatpush.msra.mxu2 %v167_v9  ;;  %v703_v14 = vld [vmem:[#allocation6 + $0x60] sm:$0xff]  ;;  %v120_v15 = vld [vmem:[#allocation8 + $0x30] sm:$0xff]  ;;  %v706_v16 = vld [vmem:[#allocation6 + $0x58] sm:$0xff] }
  0x1d   :  { %279 = vmatpush.msra.mxu0 %v242_v12  ;;  %v241_v17 = vld [vmem:[#allocation6 + $0xe8] sm:$0xff]  ;;  %v709_v19 = vld [vmem:[#allocation6 + $0x50] sm:$0xff]  ;;  %v118_v20 = vld [vmem:[#allocation8 + $0x20] sm:$0xff] }
  0x1e   :  { %133 = vmatpush.msra.mxu1 %v126_v3  ;;  %208 = vmatpush.msra.mxu2 %v166_v11  ;;  %v119_v18 = vld [vmem:[#allocation8 + $0x28] sm:$0xff]  ;;  %v240_v21 = vld [vmem:[#allocation6 + $0xe0] sm:$0xff]  ;;  %v117_v23 = vld [vmem:[#allocation8 + $0x18] sm:$0xff] }
  0x1f   :  { %245 = vmatpush.xpose.msra.mxu3 %v242_v12  ;;  %280 = vmatpush.msra.mxu0 %v241_v17  ;;  %v162_v22 = vld [vmem:[#allocation6 + $0x48] sm:$0xff]  ;;  %v116_v24 = vld [vmem:[#allocation8 + $0x10] sm:$0xff]  ;;  %v239_v25 = vld [vmem:[#allocation6 + $0xd8] sm:$0xff] }
  0x20   :  { %134 = vmatpush.msra.mxu1 %v125_v4  ;;  %209 = vmatpush.msra.mxu2 %v703_v14  ;;  %v161_v26 = vld [vmem:[#allocation6 + $0x40] sm:$0xff]  ;;  %v115_v27 = vld [vmem:[#allocation8 + $0x8] sm:$0xff]  ;;  %v712_v29 = vld [vmem:[#allocation3] sm:$0xff] }
  0x21   :  { %281 = vmatpush.msra.mxu0 %v240_v21  ;;  %v114_v28 = vld [vmem:[#allocation8] sm:$0xff]  ;;  %v238_v30 = vld [vmem:[#allocation6 + $0xd0] sm:$0xff]  ;;  %v160_v31 = vld [vmem:[#allocation6 + $0x38] sm:$0xff] }
  0x22   :  { %135 = vmatpush.msra.mxu1 %v124_v5  ;;  %210 = vmatpush.msra.mxu2 %v706_v16  ;;  %v237_v32 = vld [vmem:[#allocation6 + $0xc8] sm:$0xff]  ;;  %v159_v33 = vld [vmem:[#allocation6 + $0x30] sm:$0xff]  ;;  %v715_v34 = vld [vmem:[#allocation3 + $0x8] sm:$0xff] }
  0x23   :  { %246 = vmatpush.xpose.msra.mxu3 %v241_v17  ;;  %282 = vmatpush.msra.mxu0 %v239_v25  ;;  %v236_v35 = vld [vmem:[#allocation6 + $0xc0] sm:$0xff]  ;;  %v158_v36 = vld [vmem:[#allocation6 + $0x28] sm:$0xff]  ;;  %v235_v37 = vld [vmem:[#allocation6 + $0xb8] sm:$0xff] }
  0x24   :  { %136 = vmatpush.msra.mxu1 %v123_v8  ;;  %211 = vmatpush.msra.mxu2 %v709_v19  ;;  %v157_v38 = vld [vmem:[#allocation6 + $0x20] sm:$0xff]  ;;  %v234_v39 = vld [vmem:[#allocation6 + $0xb0] sm:$0xff]  ;;  %v156_v40 = vld [vmem:[#allocation6 + $0x18] sm:$0xff] }
  0x25   :  { %283 = vmatpush.msra.mxu0 %v238_v30  ;;  %v233_v41 = vld [vmem:[#allocation6 + $0xa8] sm:$0xff]  ;;  %v155_v42 = vld [vmem:[#allocation6 + $0x10] sm:$0xff]  ;;  %v232_v43 = vld [vmem:[#allocation6 + $0xa0] sm:$0xff] }
  0x26   :  { %137 = vmatpush.msra.mxu1 %v122_v10  ;;  %212 = vmatpush.msra.mxu2 %v162_v22  ;;  %v154_v44 = vld [vmem:[#allocation6 + $0x8] sm:$0xff]  ;;  %v231_v45 = vld [vmem:[#allocation6 + $0x98] sm:$0xff]  ;;  %v153_v46 = vld [vmem:[#allocation6] sm:$0xff] }
  0x27   :  { %247 = vmatpush.xpose.msra.mxu3 %v240_v21  ;;  %284 = vmatpush.msra.mxu0 %v237_v32  ;;  %v230_v47 = vld [vmem:[#allocation6 + $0x90] sm:$0xff]  ;;  %v229_v48 = vld [vmem:[#allocation6 + $0x88] sm:$0xff]  ;;  %v228_v49 = vld [vmem:[#allocation6 + $0x80] sm:$0xff] }
  0x28   :  { %138 = vmatpush.msra.mxu1 %v121_v13  ;;  %213 = vmatpush.msra.mxu2 %v161_v26  ;;  %v332_v2 = vld [vmem:[#allocation11 + $0x78] sm:$0xff]  ;;  %v331_v3 = vld [vmem:[#allocation11 + $0x70] sm:$0xff]  ;;  %v314_v8 = vld [vmem:[#allocation9 + $0x68] sm:$0xff] }
  0x29   :  { %285 = vmatpush.msra.mxu0 %v236_v35  ;;  %v316_v4 = vld [vmem:[#allocation9 + $0x78] sm:$0xff]  ;;  %v315_v7 = vld [vmem:[#allocation9 + $0x70] sm:$0xff]  ;;  %v313_v10 = vld [vmem:[#allocation9 + $0x60] sm:$0xff] }
  0x2a   :  { %139 = vmatpush.msra.mxu1 %v120_v15  ;;  %214 = vmatpush.msra.mxu2 %v160_v31  ;;  %v312_v12 = vld [vmem:[#allocation9 + $0x58] sm:$0xff]  ;;  %v327_v13 = vld [vmem:[#allocation11 + $0x50] sm:$0xff]  ;;  %v326_v17 = vld [vmem:[#allocation11 + $0x48] sm:$0xff] }
  0x2b   :  { %248 = vmatpush.xpose.msra.mxu3 %v239_v25  ;;  %286 = vmatpush.msra.mxu0 %v235_v37  ;;  %v311_v15 = vld [vmem:[#allocation9 + $0x50] sm:$0xff]  ;;  %v309_v21 = vld [vmem:[#allocation9 + $0x40] sm:$0xff] }
  0x2c   :  { %140 = vmatpush.msra.mxu1 %v119_v18  ;;  %215 = vmatpush.msra.mxu2 %v159_v33  ;;  %v310_v18 = vld [vmem:[#allocation9 + $0x48] sm:$0xff] }
  0x2d   :  { %287 = vmatpush.msra.mxu0 %v234_v39 }
  0x2e   :  { %141 = vmatpush.msra.mxu1 %v118_v20  ;;  %216 = vmatpush.msra.mxu2 %v158_v36  ;;  %v325_v20 = vld [vmem:[#allocation11 + $0x40] sm:$0xff] }
  0x2f   :  { %249 = vmatpush.xpose.msra.mxu3 %v238_v30  ;;  %288 = vmatpush.msra.mxu0 %v233_v41  ;;  %v322_v30 = vld [vmem:[#allocation11 + $0x28] sm:$0xff] }
  0x30   :  { %142 = vmatpush.msra.mxu1 %v117_v23  ;;  %217 = vmatpush.msra.mxu2 %v157_v38  ;;  %v324_v23 = vld [vmem:[#allocation11 + $0x38] sm:$0xff] }
  0x31   :  { %289 = vmatpush.msra.mxu0 %v232_v43 }
  0x32   :  { %143 = vmatpush.msra.mxu1 %v116_v24  ;;  %218 = vmatpush.msra.mxu2 %v156_v40  ;;  %v308_v24 = vld [vmem:[#allocation9 + $0x38] sm:$0xff] }
  0x33   :  { %250 = vmatpush.xpose.msra.mxu3 %v237_v32  ;;  %290 = vmatpush.msra.mxu0 %v231_v45  ;;  %v321_v32 = vld [vmem:[#allocation11 + $0x20] sm:$0xff] }
  0x34   :  { %144 = vmatpush.msra.mxu1 %v115_v27  ;;  %219 = vmatpush.msra.mxu2 %v155_v42  ;;  %v323_v27 = vld [vmem:[#allocation11 + $0x30] sm:$0xff] }
  0x35   :  { %291 = vmatpush.msra.mxu0 %v230_v47 }
  0x36   :  { %145 = vmatpush.msra.mxu1 %v114_v28  ;;  %220 = vmatpush.msra.mxu2 %v154_v44  ;;  %v307_v28 = vld [vmem:[#allocation9 + $0x30] sm:$0xff] }
  0x37   :  { %146 = vmatmul.f32.vlgmr.msra.gmra.mxu1 %v712_v29  ;;  %251 = vmatpush.xpose.msra.mxu3 %v236_v35  ;;  %v320_v35 = vld [vmem:[#allocation11 + $0x18] sm:$0xff] }
  0x38   :  { %169 = vmatpush.xpose.msrb.mxu1 %v168_v6  ;;  %221 = vmatpush.msra.mxu2 %v153_v46  ;;  %v330_v6 = vld [vmem:[#allocation11 + $0x68] sm:$0xff] }
  0x39   :  { %292 = vmatpush.msra.mxu0 %v229_v48 }
  0x3a   :  { %333 = vmatpush.msrb.mxu2 %v332_v2 }
  0x3b   :  { %252 = vmatpush.xpose.msra.mxu3 %v235_v37  ;;  %293 = vmatpush.msra.mxu0 %v228_v49  ;;  %v304_v37 = vld [vmem:[#allocation9 + $0x18] sm:$0xff] }
  0x3c   :  { %170 = vmatpush.xpose.msrb.mxu1 %v167_v9  ;;  %334 = vmatpush.msrb.mxu2 %v331_v3  ;;  %v329_v9 = vld [vmem:[#allocation11 + $0x60] sm:$0xff] }
  0x3d   :  { %356 = vmatpush.msrb.mxu0 %v316_v4 }
  0x3e   :  { %335 = vmatpush.msrb.mxu2 %v330_v6 }
  0x3f   :  { %149 = vmatmul.f32.gmra.mxu1 %v715_v34  ;;  %253 = vmatpush.xpose.msra.mxu3 %v234_v39  ;;  %v319_v39 = vld [vmem:[#allocation11 + $0x10] sm:$0xff] }
  0x40   :  { %171 = vmatpush.xpose.msrb.mxu1 %v166_v11  ;;  %357 = vmatpush.msrb.mxu0 %v315_v7  ;;  %v328_v11 = vld [vmem:[#allocation11 + $0x58] sm:$0xff] }
  0x41   :  { %336 = vmatpush.msrb.mxu2 %v329_v9 }
  0x42   :  { %358 = vmatpush.msrb.mxu0 %v314_v8 }
  0x43   :  { %254 = vmatpush.xpose.msra.mxu3 %v233_v41  ;;  %337 = vmatpush.msrb.mxu2 %v328_v11 }
  0x44   :  { %172 = vmatpush.xpose.msrb.mxu1 %v703_v14  ;;  %359 = vmatpush.msrb.mxu0 %v313_v10 }
  0x45   :  { %338 = vmatpush.msrb.mxu2 %v327_v13 }
  0x46   :  { %360 = vmatpush.msrb.mxu0 %v312_v12 }
  0x47   :  { %255 = vmatpush.xpose.msra.mxu3 %v232_v43  ;;  %339 = vmatpush.msrb.mxu2 %v326_v17  ;;  %v302_v43 = vld [vmem:[#allocation9 + $0x8] sm:$0xff] }
  0x48   :  { %173 = vmatpush.xpose.msrb.mxu1 %v706_v16  ;;  %361 = vmatpush.msrb.mxu0 %v311_v15 }
  0x49   :  { %340 = vmatpush.msrb.mxu2 %v325_v20 }
  0x4a   :  { %362 = vmatpush.msrb.mxu0 %v310_v18 }
  0x4b   :  { %256 = vmatpush.xpose.msra.mxu3 %v231_v45  ;;  %341 = vmatpush.msrb.mxu2 %v324_v23  ;;  %v317_v45 = vld [vmem:[#allocation11] sm:$0xff] }
  0x4c   :  { %174 = vmatpush.xpose.msrb.mxu1 %v709_v19  ;;  %363 = vmatpush.msrb.mxu0 %v309_v21 }
  0x4d   :  { %342 = vmatpush.msrb.mxu2 %v323_v27 }
  0x4e   :  { %364 = vmatpush.msrb.mxu0 %v308_v24 }
  0x4f   :  { %257 = vmatpush.xpose.msra.mxu3 %v230_v47  ;;  %343 = vmatpush.msrb.mxu2 %v322_v30  ;;  %v301_v47 = vld [vmem:[#allocation9] sm:$0xff] }
  0x50   :  { %175 = vmatpush.xpose.msrb.mxu1 %v162_v22  ;;  %365 = vmatpush.msrb.mxu0 %v307_v28 }
  0x51   :  { %344 = vmatpush.msrb.mxu2 %v321_v32 }
  0x53   :  { %258 = vmatpush.xpose.msra.mxu3 %v229_v48  ;;  %345 = vmatpush.msrb.mxu2 %v320_v35 }
  0x54   :  { %176 = vmatpush.xpose.msrb.mxu1 %v161_v26 }
  0x55   :  { %346 = vmatpush.msrb.mxu2 %v319_v39 }
  0x57   :  { %259 = vmatpush.xpose.msra.mxu3 %v228_v49 }
  0x58   :  { %177 = vmatpush.xpose.msrb.mxu1 %v160_v31  ;;  %v306_v31 = vld [vmem:[#allocation9 + $0x28] sm:$0xff] }
  0x59   :  { %366 = vmatpush.msrb.mxu0 %v306_v31 }
  0x5c   :  { %178 = vmatpush.xpose.msrb.mxu1 %v159_v33  ;;  %v305_v33 = vld [vmem:[#allocation9 + $0x20] sm:$0xff] }
  0x5d   :  { %367 = vmatpush.msrb.mxu0 %v305_v33 }
  0x5f   :  { %368 = vmatpush.msrb.mxu0 %v304_v37 }
  0x60   :  { %179 = vmatpush.xpose.msrb.mxu1 %v158_v36 }
  0x64   :  { %180 = vmatpush.xpose.msrb.mxu1 %v157_v38 }
  0x68   :  { %181 = vmatpush.xpose.msrb.mxu1 %v156_v40  ;;  %v303_v40 = vld [vmem:[#allocation9 + $0x10] sm:$0xff] }
  0x69   :  { %369 = vmatpush.msrb.mxu0 %v303_v40 }
  0x6b   :  { %370 = vmatpush.msrb.mxu0 %v302_v43 }
  0x6c   :  { %182 = vmatpush.xpose.msrb.mxu1 %v155_v42  ;;  %v318_v42 = vld [vmem:[#allocation11 + $0x8] sm:$0xff] }
  0x6d   :  { %347 = vmatpush.msrb.mxu2 %v318_v42  ;;  %371 = vmatpush.msrb.mxu0 %v301_v47 }
  0x6f   :  { %348 = vmatpush.msrb.mxu2 %v317_v45 }
  0x70   :  { %183 = vmatpush.xpose.msrb.mxu1 %v154_v44 }
  0x74   :  { %184 = vmatpush.xpose.msrb.mxu1 %v153_v46 }
  0xb4   :  { %v147_v50 = vpop.f32.mrf.mxu1 }
  0xb5   :  { %185 = vmatmul.f32.vlgmr.msrb.gmra.mxu1 %v147_v50 }
  0xbc   :  { %v150_v51 = vpop.f32.mrf.mxu1 }
  0xbd   :  { %260 = vmatmul.f32.vlgmr.msra.gmra.mxu3 %v150_v51 }
 0x132   :  { %v186_v54 = vpop.f32.mrf.mxu1 }
 0x133   :  { %v192_v55 = vsel %vm191_vm0, %v186_v54, -1e+30 }
 0x134   :  { %193 = vmax.xlane.f32.xlu0 %v192_v55 }
 0x140   :  { %v261_v56 = vpop.f32.mrf.mxu3 }
 0x141   :  { %v264_v57 = vsel %vm191_vm0, %v261_v56, -1e+30 }
 0x142   :  { %265 = vmax.xlane.f32.xlu0 %v264_v57 }
 0x1a7   :  { %v194_v58 = vpop.xlane.xlu0 %193 }
 0x1a8   :  { %v195_v59 = vsub.f32 %v192_v55, %v194_v58 }
 0x1aa   :  { %v196_v60 = vmul.f32 1.442695, %v195_v59 }
 0x1ac   :  { %439 = vpow2.f32 %v196_v60 }
 0x1b2   :  { %v440_v61 = vpop.eup %439 }
 0x1b3   :  { %198 = vadd.xlane.f32.xlu1 %v440_v61 }
 0x1b5   :  { %v266_v62 = vpop.xlane.xlu0 %265 }
 0x1b6   :  { %v267_v63 = vsub.f32 %v264_v57, %v266_v62 }
 0x1b8   :  { %v268_v0 = vmul.f32 1.442695, %v267_v63 }
 0x1ba   :  { %441 = vpow2.f32 %v268_v0 }
 0x1c0   :  { %v721_v1 = vpop.eup %441 }
 0x1c1   :  { %270 = vadd.xlane.f32.xlu1 %v721_v1 }
 0x226   :  { %v199_v5 = vpop.xlane.xlu1 %198 }
 0x227   :  { %443 = vrcp.f32 %v199_v5 }
 0x22d   :  { %v444_v14 = vpop.eup %443 }
 0x22e   :  { %v201_v16 = vmul.f32 %v444_v14, %v199_v5 }
 0x230   :  { %v202_v19 = vsub.f32 2.0, %v201_v16 }
 0x232   :  { %v203_v22 = vmul.f32 %v444_v14, %v202_v19 }
 0x234   :  { %v271_v25 = vpop.xlane.xlu1 %270  ;;  %v204_v26 = vmul.f32 %v440_v61, %v203_v22 }
 0x235   :  { %445 = vrcp.f32 %v271_v25 }
 0x236   :  { %205 = vst [vmem:[#allocation13] sm:$0xff] %v204_v26  ;;  %222 = vmatmul.f32.vlgmr.msra.gmra.mxu2 %v204_v26 }
 0x23b   :  { %v446_v36 = vpop.eup %445 }
 0x23c   :  { %v273_v38 = vmul.f32 %v446_v36, %v271_v25 }
 0x23e   :  { %v274_v41 = vsub.f32 2.0, %v273_v38  ;;  %349 = vmatmul.f32.vlgmr.msrb.gmra.mxu2 %v712_v29 }
 0x240   :  { %v275_v44 = vmul.f32 %v446_v36, %v274_v41 }
 0x242   :  { %v276_v46 = vmul.f32 %v721_v1, %v275_v44 }
 0x244   :  { %277 = vst [vmem:[#allocation13 + $0x8] sm:$0xff] %v276_v46  ;;  %294 = vmatmul.f32.vlgmr.msra.gmra.mxu0 %v276_v46 }
 0x245   :  { %416 = dma.vmem_to_hbm [thread:$0]  %s409_s20, 256, %s411_s23, [#allocation14], %s630_s29, %s630_s29, %s631_s30  }
 0x246   :  { %352 = vmatmul.f32.gmra.mxu2 %v715_v34 }
 0x2b9   :  { %v223_v48 = vpop.f32.mrf.mxu2 }
 0x2ba   :  { %372 = vmatmul.f32.vlgmr.msrb.gmra.mxu0 %v223_v48 }
 0x2c1   :  { %v295_v49 = vpop.f32.mrf.mxu0  ;;  %v350_v29 = vpop.f32.mrf.mxu2 }
 0x2c2   :  { %375 = vmatmul.f32.gmra.mxu0 %v295_v49 }
 0x2c9   :  { %v353_v51 = vpop.f32.mrf.mxu2 }
 0x337   :  { %v373_v34 = vpop.f32.mrf.mxu0 }
 0x338   :  { %v374_v50 = vadd.f32 %v373_v34, %v350_v29 }
 0x33a   :  { %447 = vtanh.f32 %v374_v50 }
 0x33f   :  { %v376_v52 = vpop.f32.mrf.mxu0 }
 0x340   :  { %v448_v53 = vpop.eup %447  ;;  %v377_v54 = vadd.f32 %v376_v52, %v353_v51 }
 0x341   :  { %381 = vst [vmem:[#allocation12] sm:$0xff] %v448_v53 }
 0x342   :  { %449 = vtanh.f32 %v377_v54 }
 0x348   :  { %v450_v55 = vpop.eup %449 }
 0x349   :  { %382 = vst [vmem:[#allocation12 + $0x8] sm:$0xff] %v450_v55 }
 0x34a   :  { %399 = dma.vmem_to_hbm [thread:$0]  %s392_s25, 256, %s394_s27, [#allocation5], %s630_s29, %s630_s29, %s631_s30  }
 0x34b   :  { %625 = dma.done.wait [#allocation5], 256  }
 0x34c   :  { %626 = vsyncadd [#allocation5], 4294967040 }
 0x34d   :  { %627 = dma.done.wait [#allocation14], 256  }
 0x34e   :  { %628 = vsyncadd [#allocation14], 4294967040 }
 0x34f   :  { %425 = vsyncpa [#allocation4], 1 }
 0x350   :  { %426 = vsyncpa [#allocation7], 1 }
 0x351   :  { %427 = vsyncpa [#allocation10], 1 }
 0x352   :  { %428 = vsyncpa [#allocation5], 1 }
 0x353   :  { %429 = vsyncpa [#allocation14], 1 }

</bundles_post_ra>
